<compile_context>
chip_gen: v7x
topology: tpu7x:2x2x1
jax: 0.10.0
libtpu: 0.0.40
codegen_flags: <defaults>
</compile_context>

<pallas_src>
import jax
import jax.numpy as jnp
from jax.experimental import pallas as pl
from jax.experimental.pallas import tpu as pltpu


def _scaled_linear_kernel(x_ref, w_ref, o_ref):
    # VPU: elementwise scale (free filler alongside the MXU op).
    x2 = x_ref[...] * 2.0                      # (B, IN)
    # MXU: y[b, o] = sum_i x2[b, i] * w[o, i]  == (x * 2) @ W^T
    # dot_general contracting dims (1, 1) consumes the torch-layout weight
    # directly — no transpose anywhere.
    o_ref[...] = jax.lax.dot_general(
        x2,
        w_ref[...],                            # (OUT, IN), torch Linear layout
        dimension_numbers=(((1,), (1,)), ((), ())),
        preferred_element_type=jnp.float32,
    ).astype(o_ref.dtype)


@jax.jit
def model_forward(x, weight):
    """x: (B, 3) float32; weight: (out=3, in=3) float32 (torch Linear layout)."""
    B, _ = x.shape
    OUT = weight.shape[0]

    # No grid: a 1-point grid only adds prologue/epilogue and double-buffer
    # setup for a few-hundred-byte problem.  Whole arrays live in VMEM.
    return pl.pallas_call(
        _scaled_linear_kernel,
        out_shape=jax.ShapeDtypeStruct((B, OUT), x.dtype),
        in_specs=[
            pl.BlockSpec(memory_space=pltpu.MemorySpace.VMEM),
            pl.BlockSpec(memory_space=pltpu.MemorySpace.VMEM),
        ],
        out_specs=pl.BlockSpec(memory_space=pltpu.MemorySpace.VMEM),
    )(x, weight)


if __name__ == "__main__":
    key = jax.random.PRNGKey(0)
    kx, kw = jax.random.split(key)

    B, IN, OUT = 8, 3, 3
    x = jax.random.normal(kx, (B, IN), dtype=jnp.float32)
    # Deterministic init mimicking torch.nn.Linear default (uniform +/- 1/sqrt(in))
    bound = 1.0 / (IN ** 0.5)
    weight = jax.random.uniform(
        kw, (OUT, IN), dtype=jnp.float32, minval=-bound, maxval=bound
    )

    out = model_forward(x, weight)
    out = jax.block_until_ready(out)

    # Reference check in plain JAX
    ref = (x * 2.0) @ weight.T
    assert out.shape == (B, OUT)
    assert jnp.allclose(out, ref, atol=1e-5, rtol=1e-5)
    print("KERNEL_OK")
</pallas_src>

<mosaic_0001>
module attributes {stable_mosaic.version = 11 : i64} {
  func.func @_scaled_linear_kernel(%arg0: memref<8x3xf32, #tpu.memory_space<vmem>>, %arg1: memref<3x3xf32, #tpu.memory_space<vmem>>, %arg2: memref<8x3xf32, #tpu.memory_space<vmem>>) attributes {dimension_semantics = [], scalar_prefetch = 0 : i64, scratch_operands = 0 : i64, tpu.core_type = #tpu.core_type<tc>} {
    %c0 = arith.constant 0 : index
    %c0_0 = arith.constant 0 : index
    %0 = vector.load %arg0[%c0, %c0_0] : memref<8x3xf32, #tpu.memory_space<vmem>>, vector<8x3xf32>
    %cst = arith.constant 2.000000e+00 : f32
    %1 = vector.broadcast %cst : f32 to vector<8x3xf32>
    %2 = arith.mulf %0, %1 : vector<8x3xf32>
    %c0_1 = arith.constant 0 : index
    %c0_2 = arith.constant 0 : index
    %3 = vector.load %arg1[%c0_1, %c0_2] : memref<3x3xf32, #tpu.memory_space<vmem>>, vector<3x3xf32>
    %cst_3 = arith.constant dense<0.000000e+00> : vector<8x3xf32>
    %4 = tpu.matmul %2, %3, %cst_3 {dimension_numbers = #tpu.dot_dimension_numbers<[1], [1], [0], [0], [0, 0, 1, 0], [], []>} : vector<8x3xf32>, vector<3x3xf32>, vector<8x3xf32> -> vector<8x3xf32>
    %c0_4 = arith.constant 0 : index
    %c0_5 = arith.constant 0 : index
    %5 = vector.load %arg2[%c0_4, %c0_5] : memref<8x3xf32, #tpu.memory_space<vmem>>, vector<8x3xf32>
    tpu.vector_store %arg2[%c0_4, %c0_5], %4 {strides = array<i32>} : memref<8x3xf32, #tpu.memory_space<vmem>>, vector<8x3xf32>,
    return
  }
}

</mosaic_0001>

<bundles_post_ra>
// kernel: model_forward.1
= control target key start
LH: loop header
LB: loop body
LE: loop exit
PB: predicated region body
PF: predicated region fallthrough
CT: control target
= control target key end

     0   :  { %vm14_vm0 = vcmask 23552   ;;  %v107_v0 = vmov 0.0   ;;  %vm108_vm1 = vmmov 0   ;;  %s133_s1 = inlined_call_operand.vmem [shape: f32[3,3], index: 1, kind: input, shape index: {}]   ;;  %s134_s0 = inlined_call_operand.vmem [shape: f32[8,3], index: 0, kind: input, shape index: {}]   ;;  %s135_s2 = inlined_call_operand.vmem [shape: f32[8,3], index: 2, kind: output, shape index: {}]  }
   0x1   :  { %100 = vmatprep.subr.mxu0 %v107_v0  ;;  %v13_v1 = vld [vmem:[%s133_s1] sm:$0x7]  ;;  %102 = vmatprep.mubr.msk.f32.mxu0 %vm108_vm1, %v107_v0 }
   0x2   :  { %v11_v2 = vld [vmem:[%s134_s0] sm:$0xff]  ;;  %101 = vmatpush3.xpose.msk.msra.mxu0 %vm14_vm0, %v13_v1 }
   0x3   :  { %v12_v3 = vmul.f32 2.0, %v11_v2 }
   0x5   :  { %103 = vmatmul.mubr.msk.f32.vlgmr.msra.gmra.mrb[0].mxu0 %vm14_vm0, %v12_v3 }
  0xd8   :  { %v87_v4 = vpop.f32.mrb[0].mxu0 }
  0xd9   :  { %91 = vst.msk [vmem:[%s135_s2] sm:$0xff] %vm14_vm0, %v87_v4  ;;  %v104_v5 = vpop.f32.mrb[1].mxu0 }

</bundles_post_ra>
